<compile_context>
chip_gen: v7x
topology: tpu7x:2x2x1
jax: 0.10.0
libtpu: 0.0.40
codegen_flags: <defaults>
</compile_context>

<pallas_src>
import jax
import jax.numpy as jnp
from jax.experimental import pallas as pl
from jax.experimental.pallas import tpu as pltpu

INPUT_SIZE = 24
PACK = 16                      # original rows packed per lane-dense row (16 * 24 = 384 = 3*128)
PACKED_W = PACK * INPUT_SIZE   # 384
TB_DEFAULT = 32768             # original rows per grid step (packed rows = TB/16); sweep 8K-64K


def logreg_kernel(x_ref, w_ref, b_ref, o_ref):
    # x_ref: (TBp, 384) f32 -- 16 original 24-feature rows packed per lane-dense row
    # w_ref: (384, 16)  f32 -- block-diagonal weight, VMEM-resident (constant index_map)
    # b_ref: (1, 1)     f32 -- bias, VMEM-resident
    # o_ref: (TBp, 16)  f32 -- probabilities; row-major order == original (16*TBp, 1)
    logits = jnp.dot(x_ref[...], w_ref[...], preferred_element_type=jnp.float32)
    logits = logits + b_ref[...]                     # broadcast (1, 1) bias
    # sigmoid(x) == 0.5 * tanh(0.5 * x) + 0.5 : a single EUP op per vreg (no exp + divide).
    o_ref[...] = 0.5 * jnp.tanh(0.5 * logits) + 0.5


def _round_up(n, m):
    return ((n + m - 1) // m) * m


def logistic_regression(x, weight, bias, tb=TB_DEFAULT):
    """x: (B, 24) f32, weight: (1, 24) f32 (nn.Linear layout), bias: (1,) f32 -> (B, 1) probs."""
    B, D = x.shape
    assert D == INPUT_SIZE and weight.shape == (1, D)
    x = x.astype(jnp.float32)

    # Pad the batch only up to a multiple of 128 (pack factor 16 x 8 sublanes): at most 127
    # extra rows, and zero overhead when B is already 128-aligned.  Never pad to tb.
    Bp = _round_up(max(B, 128), 128)
    if Bp != B:
        x = jnp.pad(x, ((0, Bp - B), (0, 0)))

    # Free metadata reshape of the contiguous (Bp, 24) array into lane-dense (Bp/16, 384) rows.
    Rp = Bp // PACK
    xp = x.reshape(Rp, PACKED_W)

    # Packed-row tile: multiple of 8 sublanes, capped by the (packed) batch; ragged tail
    # handled by the cdiv grid (no pad-to-tile).
    tbp = max(8, min(_round_up(tb, PACK) // PACK, Rp))
    tbp = (tbp // 8) * 8
    grid = pl.cdiv(Rp, tbp)

    # Block-diagonal weight (384, 16): column c carries w over rows c*24 .. c*24+23, so
    # (xp @ w_bd)[r, c] == dot(x[16*r + c], w).  Built once in the wrapper (tiny, 24 KiB).
    w = weight.astype(jnp.float32).reshape(D)
    w_bd = (jnp.eye(PACK, dtype=jnp.float32)[:, None, :] * w[None, :, None]).reshape(
        PACKED_W, PACK)
    b2d = bias.reshape(1, 1).astype(jnp.float32)

    out = pl.pallas_call(
        logreg_kernel,
        out_shape=jax.ShapeDtypeStruct((Rp, PACK), jnp.float32),
        grid_spec=pltpu.PrefetchScalarGridSpec(
            num_scalar_prefetch=0,
            grid=(grid,),
            in_specs=[
                pl.BlockSpec((tbp, PACKED_W), lambda i: (i, 0)),    # streamed lane-dense x
                pl.BlockSpec((PACKED_W, PACK), lambda i: (0, 0)),   # weight: VMEM-resident
                pl.BlockSpec((1, 1), lambda i: (0, 0)),             # bias:   VMEM-resident
            ],
            out_specs=pl.BlockSpec((tbp, PACK), lambda i: (i, 0)),
        ),
        compiler_params=pltpu.CompilerParams(
            dimension_semantics=("parallel",),        # shard batch tiles across v7x's 2 TCs
            vmem_limit_bytes=48 * 1024 * 1024,        # < v7x's 64 MiB physical, plenty of room
        ),
    )(xp, w_bd, b2d)

    # Row-major (Rp, 16) == (Bp, 1): free reshape, then drop the (<128) pad rows.
    return out.reshape(Bp, 1)[:B]


if __name__ == "__main__":
    key = jax.random.PRNGKey(0)
    kx, kw, kb = jax.random.split(key, 3)

    # Small demo: B=200 exercises the pad-to-128 path and the packed layout; still one tile.
    B = 200
    x = jax.random.normal(kx, (B, INPUT_SIZE), dtype=jnp.float32)

    # Deterministic parameter init (mimics nn.Linear uniform(-1/sqrt(D), 1/sqrt(D))).
    bound = 1.0 / float(INPUT_SIZE) ** 0.5
    weight = jax.random.uniform(kw, (1, INPUT_SIZE), jnp.float32, minval=-bound, maxval=bound)
    bias = jax.random.uniform(kb, (1,), jnp.float32, minval=-bound, maxval=bound)

    probs = logistic_regression(x, weight, bias)
    probs = jax.block_until_ready(probs)

    # Pure-JAX reference check.
    ref = jax.nn.sigmoid(x @ weight.T + bias)
    assert probs.shape == (B, 1)
    assert jnp.allclose(probs, ref, atol=1e-5, rtol=1e-5)

    print("KERNEL_OK")
</pallas_src>

<mosaic_0001>
module attributes {stable_mosaic.version = 11 : i64} {
  func.func @logreg_kernel(%arg0: i32, %arg1: memref<16x384xf32, #tpu.memory_space<vmem>>, %arg2: memref<384x16xf32, #tpu.memory_space<vmem>>, %arg3: memref<1x1xf32, #tpu.memory_space<vmem>>, %arg4: memref<16x16xf32, #tpu.memory_space<vmem>>) attributes {dimension_semantics = [#tpu.dimension_semantics<parallel>], iteration_bounds = array<i64: 1>, scalar_prefetch = 0 : i64, scratch_operands = 0 : i64, tpu.core_type = #tpu.core_type<tc>, window_params = [{transform_indices = @transform_0, window_bounds = array<i64: 16, 384>}, {pipeline_mode = #tpu.pipeline_mode<synchronous>, transform_indices = @transform_1, window_bounds = array<i64: 384, 16>}, {pipeline_mode = #tpu.pipeline_mode<synchronous>, transform_indices = @transform_2, window_bounds = array<i64: 1, 1>}, {transform_indices = @transform_3, window_bounds = array<i64: 16, 16>}]} {
    %c0 = arith.constant 0 : index
    %c0_0 = arith.constant 0 : index
    %0 = vector.load %arg1[%c0, %c0_0] : memref<16x384xf32, #tpu.memory_space<vmem>>, vector<16x384xf32>
    %c0_1 = arith.constant 0 : index
    %c0_2 = arith.constant 0 : index
    %1 = vector.load %arg2[%c0_1, %c0_2] : memref<384x16xf32, #tpu.memory_space<vmem>>, vector<384x16xf32>
    %cst = arith.constant dense<0.000000e+00> : vector<16x16xf32>
    %2 = tpu.matmul %0, %1, %cst {dimension_numbers = #tpu.dot_dimension_numbers<[1], [0], [0], [1], [0, 0, 1, 1], [], []>} : vector<16x384xf32>, vector<384x16xf32>, vector<16x16xf32> -> vector<16x16xf32>
    %c0_3 = arith.constant 0 : index
    %c0_4 = arith.constant 0 : index
    %3 = vector.load %arg3[%c0_3, %c0_4] : memref<1x1xf32, #tpu.memory_space<vmem>>, vector<1x1xf32>
    %4 = vector.broadcast %3 : vector<1x1xf32> to vector<16x16xf32>
    %5 = arith.addf %2, %4 : vector<16x16xf32>
    %cst_5 = arith.constant 5.000000e-01 : f32
    %6 = vector.broadcast %cst_5 : f32 to vector<16x16xf32>
    %7 = arith.mulf %6, %5 : vector<16x16xf32>
    %8 = math.tanh %7 : vector<16x16xf32>
    %cst_6 = arith.constant 5.000000e-01 : f32
    %9 = vector.broadcast %cst_6 : f32 to vector<16x16xf32>
    %10 = arith.mulf %9, %8 : vector<16x16xf32>
    %cst_7 = arith.constant 5.000000e-01 : f32
    %11 = vector.broadcast %cst_7 : f32 to vector<16x16xf32>
    %12 = arith.addf %10, %11 : vector<16x16xf32>
    %c0_8 = arith.constant 0 : index
    %c0_9 = arith.constant 0 : index
    %13 = vector.load %arg4[%c0_8, %c0_9] : memref<16x16xf32, #tpu.memory_space<vmem>>, vector<16x16xf32>
    tpu.vector_store %arg4[%c0_8, %c0_9], %12 {strides = array<i32>} : memref<16x16xf32, #tpu.memory_space<vmem>>, vector<16x16xf32>,
    return
  }
  func.func @transform_0(%arg0: i32) -> (i32, i32) {
    %c0_i32 = arith.constant 0 : i32
    %c0_i32_0 = arith.constant 0 : i32
    return %arg0, %c0_i32 : i32, i32
  }
  func.func @transform_1(%arg0: i32) -> (i32, i32) {
    %c0_i32 = arith.constant 0 : i32
    %c0_i32_0 = arith.constant 0 : i32
    %c0_i32_1 = arith.constant 0 : i32
    return %c0_i32, %c0_i32_0 : i32, i32
  }
  func.func @transform_2(%arg0: i32) -> (i32, i32) {
    %c0_i32 = arith.constant 0 : i32
    %c0_i32_0 = arith.constant 0 : i32
    %c0_i32_1 = arith.constant 0 : i32
    return %c0_i32, %c0_i32_0 : i32, i32
  }
  func.func @transform_3(%arg0: i32) -> (i32, i32) {
    %c0_i32 = arith.constant 0 : i32
    %c0_i32_0 = arith.constant 0 : i32
    return %arg0, %c0_i32 : i32, i32
  }
}

</mosaic_0001>

<bundles_post_ra>
// kernel: tpu_custom_call.1
= control target key start
LH: loop header
LB: loop body
LE: loop exit
PB: predicated region body
PF: predicated region fallthrough
CT: control target
= control target key end

     0   :  { %s648_s0 = inlined_call_operand.vmem [shape: f32[16,384], index: 0, kind: input, shape index: {}]   ;;  %s649_s1 = inlined_call_operand.vmem [shape: f32[384,16], index: 1, kind: input, shape index: {}]   ;;  %s650_s2 = inlined_call_operand.<no memory space> [shape: f32[1,1], index: 2, kind: input, shape index: {}]   ;;  %s651_s3 = inlined_call_operand.hbm [shape: f32[16,16], index: 3, kind: output, shape index: {}]  }
   0x1   :  { %v8_v0 = vstv %s650_s2 }
   0x2   :  { %9 = vst [vmem:[#allocation2] sm:$0x1] %v8_v0 }
   0x3   :  { %v39_v1 = vld [vmem:[%s649_s1 + $0x80] sm:$0xff]  ;;  %v40_v2 = vld [vmem:[%s649_s1 + $0x88] sm:$0xff]  ;;  %v41_v6 = vld [vmem:[%s649_s1 + $0x90] sm:$0xff]  ;;  %v447_v8 = vmov 0  }
   0x4   :  { %v23_v3 = vld [vmem:[%s649_s1] sm:$0xff]  ;;  %v350_v4 = vpack.c.bf16 %v40_v2, %v39_v1  ;;  %v24_v5 = vld [vmem:[%s649_s1 + $0x8] sm:$0xff]  ;;  %v42_v7 = vld [vmem:[%s649_s1 + $0x98] sm:$0xff]  ;;  %418 = vset.pattern.permute.xlu0 %v447_v8 }
   0x5   :  { %v352_v9 = vpack.c.bf16 %v24_v5, %v23_v3  ;;  %v354_v10 = vpack.c.bf16 %v42_v7, %v41_v6  ;;  %v55_v11 = vld [vmem:[%s649_s1 + $0x100] sm:$0xff]  ;;  %v56_v12 = vld [vmem:[%s649_s1 + $0x108] sm:$0xff]  ;;  %v25_v13 = vld [vmem:[%s649_s1 + $0x10] sm:$0xff] }
   0x6   :  { %351 = vmatprep.subr.bf16.mxu0 %v350_v4  ;;  %v382_v14 = vpack.c.bf16 %v56_v12, %v55_v11  ;;  %v26_v15 = vld [vmem:[%s649_s1 + $0x18] sm:$0xff]  ;;  %v43_v16 = vld [vmem:[%s649_s1 + $0xa0] sm:$0xff]  ;;  %v44_v17 = vld [vmem:[%s649_s1 + $0xa8] sm:$0xff] }
   0x7   :  { %353 = vmatpush3.bf16.msra.mxu0 %v352_v9  ;;  %v356_v18 = vpack.c.bf16 %v26_v15, %v25_v13  ;;  %v57_v19 = vld [vmem:[%s649_s1 + $0x110] sm:$0xff]  ;;  %v58_v20 = vld [vmem:[%s649_s1 + $0x118] sm:$0xff]  ;;  %v358_v21 = vpack.c.bf16 %v44_v17, %v43_v16  ;;  %v27_v23 = vld [vmem:[%s649_s1 + $0x20] sm:$0xff] }
   0x8   :  { %355 = vmatprep.subr.bf16.mxu0 %v354_v10  ;;  %383 = vmatprep.subr.bf16.mxu1 %v382_v14  ;;  %v386_v22 = vpack.c.bf16 %v58_v20, %v57_v19  ;;  %v28_v24 = vld [vmem:[%s649_s1 + $0x28] sm:$0xff]  ;;  %v45_v25 = vld [vmem:[%s649_s1 + $0xb0] sm:$0xff]  ;;  %v46_v26 = vld [vmem:[%s649_s1 + $0xb8] sm:$0xff] }
   0x9   :  { %385 = vmatpush3.bf16.msra.mxu1 %v382_v14  ;;  %v59_v27 = vld [vmem:[%s649_s1 + $0x120] sm:$0xff]  ;;  %v60_v28 = vld [vmem:[%s649_s1 + $0x128] sm:$0xff]  ;;  %v360_v30 = vpack.c.bf16 %v28_v24, %v27_v23  ;;  %v61_v31 = vld [vmem:[%s649_s1 + $0x130] sm:$0xff]  ;;  %v362_v33 = vpack.c.bf16 %v46_v26, %v45_v25 }
   0xa   :  { %387 = vmatprep.subr.bf16.mxu1 %v386_v22  ;;  %v390_v29 = vpack.c.bf16 %v60_v28, %v59_v27  ;;  %v62_v32 = vld [vmem:[%s649_s1 + $0x138] sm:$0xff]  ;;  %v29_v34 = vld [vmem:[%s649_s1 + $0x30] sm:$0xff]  ;;  %v47_v36 = vld [vmem:[%s649_s1 + $0xc0] sm:$0xff] }
   0xb   :  { %357 = vmatpush3.bf16.msra.mxu0 %v356_v18  ;;  %v30_v35 = vld [vmem:[%s649_s1 + $0x38] sm:$0xff]  ;;  %v48_v37 = vld [vmem:[%s649_s1 + $0xc8] sm:$0xff]  ;;  %v394_v38 = vpack.c.bf16 %v62_v32, %v61_v31  ;;  %v63_v40 = vld [vmem:[%s649_s1 + $0x140] sm:$0xff] }
   0xc   :  { %359 = vmatprep.subr.bf16.mxu0 %v358_v21  ;;  %v364_v39 = vpack.c.bf16 %v30_v35, %v29_v34  ;;  %v64_v41 = vld [vmem:[%s649_s1 + $0x148] sm:$0xff]  ;;  %v366_v42 = vpack.c.bf16 %v48_v37, %v47_v36  ;;  %v31_v43 = vld [vmem:[%s649_s1 + $0x40] sm:$0xff]  ;;  %v49_v45 = vld [vmem:[%s649_s1 + $0xd0] sm:$0xff] }
   0xd   :  { %389 = vmatpush3.bf16.msra.mxu1 %v386_v22  ;;  %v32_v44 = vld [vmem:[%s649_s1 + $0x48] sm:$0xff]  ;;  %v50_v46 = vld [vmem:[%s649_s1 + $0xd8] sm:$0xff]  ;;  %v398_v47 = vpack.c.bf16 %v64_v41, %v63_v40  ;;  %v33_v50 = vld [vmem:[%s649_s1 + $0x50] sm:$0xff] }
   0xe   :  { %391 = vmatprep.subr.bf16.mxu1 %v390_v29  ;;  %v18_v48 = vld [vmem:[%s648_s0 + $0x8] sm:$0xff]  ;;  %v368_v49 = vpack.c.bf16 %v32_v44, %v31_v43  ;;  %v65_v51 = vld [vmem:[%s649_s1 + $0x150] sm:$0xff]  ;;  %v66_v52 = vld [vmem:[%s649_s1 + $0x158] sm:$0xff]  ;;  %v370_v53 = vpack.c.bf16 %v50_v46, %v49_v45 }
   0xf   :  { %361 = vmatpush3.bf16.msra.mxu0 %v360_v30  ;;  %145 = vmatprep.mubr.f32.mxu0 %v18_v48  ;;  %v34_v54 = vld [vmem:[%s649_s1 + $0x58] sm:$0xff]  ;;  %v51_v55 = vld [vmem:[%s649_s1 + $0xe0] sm:$0xff]  ;;  %v19_v56 = vld [vmem:[%s648_s0 + $0x10] sm:$0xff] }
  0x10   :  { %363 = vmatprep.subr.bf16.mxu0 %v362_v33  ;;  %v52_v57 = vld [vmem:[%s649_s1 + $0xe8] sm:$0xff]  ;;  %347 = vmatprep.mubr.f32.mxu1 %v19_v56  ;;  %v258_v58 = vld [vmem:[#allocation2] ss:$0 sm:$0xff] }
  0x11   :  { %393 = vmatpush3.bf16.msra.mxu1 %v390_v29 }
  0x12   :  { %395 = vmatprep.subr.bf16.mxu1 %v394_v38 }
  0x13   :  { %365 = vmatpush3.bf16.msra.mxu0 %v364_v39 }
  0x14   :  { %367 = vmatprep.subr.bf16.mxu0 %v366_v42 }
  0x15   :  { %397 = vmatpush3.bf16.msra.mxu1 %v394_v38 }
  0x16   :  { %10 = vsyncpa [#allocation4], 0  ;;  %399 = vmatprep.subr.bf16.mxu1 %v398_v47  ;;  %v402_v59 = vpack.c.bf16 %v66_v52, %v65_v51  ;;  %78 = vperm.xlu0 %418, %v258_v58   ;;  %v372_v60 = vpack.c.bf16 %v34_v54, %v33_v50  ;;  %v67_v61 = vld [vmem:[%s649_s1 + $0x160] sm:$0xff]  ;;  %v68_v62 = vld [vmem:[%s649_s1 + $0x168] sm:$0xff]  ;;  %v374_v63 = vpack.c.bf16 %v52_v57, %v51_v55  ;;  %vm239_vm0 = vcmask 130048  }
  0x17   :  { %369 = vmatpush3.bf16.msra.mxu0 %v368_v49  ;;  %v35_v0 = vld [vmem:[%s649_s1 + $0x60] sm:$0xff]  ;;  %v36_v1 = vld [vmem:[%s649_s1 + $0x68] sm:$0xff]  ;;  %v53_v2 = vld [vmem:[%s649_s1 + $0xf0] sm:$0xff]  ;;  %v406_v4 = vpack.c.bf16 %v68_v62, %v67_v61 }
  0x18   :  { %371 = vmatprep.subr.bf16.mxu0 %v370_v53  ;;  %v54_v3 = vld [vmem:[%s649_s1 + $0xf8] sm:$0xff]  ;;  %v376_v5 = vpack.c.bf16 %v36_v1, %v35_v0  ;;  %v69_v6 = vld [vmem:[%s649_s1 + $0x170] sm:$0xff]  ;;  %v17_v13 = vld [vmem:[%s648_s0] sm:$0xff] }
  0x19   :  { %401 = vmatpush3.bf16.msra.mxu1 %v398_v47  ;;  %v70_v7 = vld [vmem:[%s649_s1 + $0x178] sm:$0xff]  ;;  %v378_v8 = vpack.c.bf16 %v54_v3, %v53_v2  ;;  %v37_v9 = vld [vmem:[%s649_s1 + $0x70] sm:$0xff]  ;;  %v21_v14 = vld [vmem:[%s648_s0 + $0x20] sm:$0xff] }
  0x1a   :  { %403 = vmatprep.subr.bf16.mxu1 %v402_v59  ;;  %v38_v10 = vld [vmem:[%s649_s1 + $0x78] sm:$0xff]  ;;  %v410_v11 = vpack.c.bf16 %v70_v7, %v69_v6  ;;  %v22_v15 = vld [vmem:[%s648_s0 + $0x28] sm:$0xff] }
  0x1b   :  { %373 = vmatpush3.bf16.msra.mxu0 %v372_v60  ;;  %v380_v12 = vpack.c.bf16 %v38_v10, %v37_v9  ;;  %v20_v16 = vld [vmem:[%s648_s0 + $0x18] sm:$0xff]  ;;  %s448_s0 = smov [#allocation3]  }
  0x1c   :  { %375 = vmatprep.subr.bf16.mxu0 %v374_v63  ;;  %s247_s9 = sshll.u32 %s448_s0, 4  ;;  %s248_s9 = int_to_ptr.vmem [resolvable:$true] %s247_s9 }
  0x1d   :  { %405 = vmatpush3.bf16.msra.mxu1 %v402_v59  ;;  %s423_s10 = scalar_lea.vmem %s248_s9, 256  ;;  %p428_p1 = scmp.lt.s32.totalorder %s248_s9, %s248_s9 }
  0x1e   :  { %407 = vmatprep.subr.bf16.mxu1 %v406_v4  ;;  %p424_p0 = scmp.ne.s32.totalorder %s248_s9, %s423_s10  ;;  %p429_p2 = scmp.lt.s32.totalorder %s423_s10, %s423_s10 }
  0x1f   :  { %377 = vmatpush3.bf16.msra.mxu0 %v376_v5 }
  0x20   :  { %379 = vmatprep.subr.bf16.mxu0 %v378_v8  ;;  %p430_p3 = por %p429_p2, %p428_p1 }
  0x21   :  { %409 = vmatpush3.bf16.msra.mxu1 %v406_v4 }
  0x22   :  { %411 = vmatprep.subr.bf16.mxu1 %v410_v11  ;;  %p431_p4 = pnand %p430_p3, %p424_p0 }
  0x23   :  { %381 = vmatpush3.bf16.msra.mxu0 %v380_v12 }
  0x25   :  { %413 = vmatpush3.bf16.msra.mxu1 %v410_v11 }
  0x26   :  { %146 = vmatmul.mubr.f32.vlgmr.msra.gmra.mrb[0].mxu0 %v17_v13 }
  0x27   :  { %150 = vmatprep.mubr.f32.mxu0 %v21_v14 }
  0x28   :  { %348 = vmatmul.mubr.f32.vlgmr.msra.gmra.mrb[0].mxu1 %v22_v15 }
  0x2a   :  { %151 = vmatmul.mubr.f32.gmra.mrb[2].mxu0 %v20_v16 }
  0x95   :  { %v79_v19 = vpop.permute.xlu0 %78 }
  0xf9   :  { %v291_v17 = vpop.f32.mrb[0].mxu0 }
  0xfa   :  { %v292_v18 = vpop.f32.mrb[1].mxu0 }
  0xfb   :  { %v293_v20 = vadd.f32 %v292_v18, %v291_v17  ;;  %v349_v21 = vpop.f32.mrb[0].mxu1 }
  0xfc   :  { %v222_v22 = vpop.f32.mrb[1].mxu1 }
  0xfd   :  { %v148_v23 = vadd.f32 %v293_v20, %v79_v19  ;;  %v294_v24 = vpop.f32.mrb[2].mxu0 }
  0xfe   :  { %v295_v25 = vpop.f32.mrb[3].mxu0 }
  0xff   :  { %v296_v26 = vadd.f32 %v295_v25, %v294_v24  ;;  %v223_v27 = vadd.f32 %v222_v22, %v148_v23 }
 0x101   :  { %v153_v28 = vadd.f32 %v296_v26, %v79_v19  ;;  %v231_v29 = vmul.f32 0.5, %v223_v27 }
 0x103   :  { %v228_v30 = vadd.f32 %v349_v21, %v153_v28  ;;  %419 = vtanh.f32 %v231_v29 }
 0x105   :  { %v232_v31 = vmul.f32 0.5, %v228_v30 }
 0x107   :  { %421 = vtanh.f32 %v232_v31 }
 0x10d   :  { %v420_v32 = vpop.eup %419 }
 0x10e   :  { %v235_v33 = vmul.f32 0.5, %v420_v32 }
 0x110   :  { %v237_v34 = vadd.f32 0.5, %v235_v33 }
 0x111   :  { %v422_v35 = vpop.eup %421 }
 0x112   :  { %v236_v36 = vmul.f32 0.5, %v422_v35  ;;  %240 = vst.msk [vmem:[#allocation3] sm:$0xff] %vm239_vm0, %v237_v34 }
 0x114   :  { %v238_v37 = vadd.f32 0.5, %v236_v36 }
 0x116   :  { %241 = vst.msk [vmem:[#allocation3 + $0x8] sm:$0xff] %vm239_vm0, %v238_v37 }
 0x117   :  { %434 = shalt.err (!%p431_p4)
}
 0x118   :  { %s435_s13 = scalar_lea.hbm %s651_s3, 256 }
 0x119   :  { %p436_p5 = scmp.ne.s32.totalorder %s651_s3, %s435_s13  ;;  %p439_p6 = scmp.lt.u32.totalorder %s435_s13, %s651_s3 }
 0x11b   :  { %p441_p7 = pnand %p439_p6, %p436_p5 }
 0x11d   :  { %444 = shalt.err (!%p441_p7)
}
 0x11e   :  { %s449_s18 = smov 128   ;;  %s450_s19 = smov 8  }
 0x11f   :  { %253 = dma.vmem_to_hbm [thread:$0]  %s248_s9, 256, %s651_s3, [#allocation4], %s449_s18, %s449_s18, %s450_s19  }
 0x120   :  { %445 = dma.done.wait [#allocation4], 256  }
 0x121   :  { %446 = vsyncadd [#allocation4], 4294967040 }
 0x122   :  { %257 = vsyncpa [#allocation4], 1 }

</bundles_post_ra>
